<compile_context>
chip_gen: v6e
topology: v6e:2x2x1
jax: 0.10.0
libtpu: 0.0.40
codegen_flags: <defaults>
</compile_context>

<pallas_src>
import math
import functools

import jax
import jax.numpy as jnp
from jax import lax
from jax.experimental import pallas as pl
from jax.experimental.pallas import tpu as pltpu

LN_EPS = 1e-12

# VMEM budget: <= ~48 MiB keeps double-buffered blocks inside v7x's 64 MiB
# physical VMEM while raising the 16/32 MiB scoped defaults on v5e/v6e.
_VMEM_LIMIT_BYTES = 48 * 1024 * 1024

# Tile sizes used when shapes are large enough (fall back to full extent
# otherwise, e.g. for the toy shapes in __main__).
_ATTN_Q_TILE = 256
_FFN_S_TILE = 256
_FFN_I_TILE = 512


def _pick_tile(n, pref):
    """Use `pref` if it evenly divides n, otherwise the full extent."""
    return pref if (n % pref == 0) else n


# ----------------------------- in-kernel helpers -----------------------------

def _layernorm(x, gamma, beta, eps=LN_EPS):
    # BertLayerNorm: biased variance, eps inside the sqrt, all in f32.
    u = jnp.mean(x, axis=-1, keepdims=True)
    s = jnp.mean((x - u) ** 2, axis=-1, keepdims=True)
    xn = (x - u) / jnp.sqrt(s + eps)
    return gamma * xn + beta


# ------------------------------ attention kernel -----------------------------
# One (batch, query-tile) grid step computes the full BertAttention block:
# QKV projections, head-batched scores/softmax/context, output dense,
# residual and LayerNorm.

def _attention_kernel(num_heads,
                      q_in_ref, kv_in_ref, mask_ref,
                      wq_ref, bq_ref, wk_ref, bk_ref, wv_ref, bv_ref,
                      wo_ref, bo_ref, g_ref, beta_ref,
                      out_ref):
    x = q_in_ref[...]                   # (tq, H) f32 — query input / residual
    kv = kv_in_ref[...]                 # (Sk, H) f32 — key/value input
    mask = mask_ref[...]                # (1, Sk) f32 — additive mask row

    x_bf = x.astype(jnp.bfloat16)
    kv_bf = kv.astype(jnp.bfloat16)

    # QKV projections: bf16 operands, f32 accumulation on the MXU.
    q = jnp.dot(x_bf, wq_ref[...], preferred_element_type=jnp.float32) + bq_ref[...]
    k = jnp.dot(kv_bf, wk_ref[...], preferred_element_type=jnp.float32) + bk_ref[...]
    v = jnp.dot(kv_bf, wv_ref[...], preferred_element_type=jnp.float32) + bv_ref[...]

    tq, H = q.shape
    Sk = k.shape[0]
    nh = num_heads
    hd = H // nh
    scale = 1.0 / math.sqrt(hd)

    qh = q.astype(jnp.bfloat16).reshape(tq, nh, hd)   # (tq, nh, hd)
    kh = k.astype(jnp.bfloat16).reshape(Sk, nh, hd)   # (Sk, nh, hd)
    vh = v.astype(jnp.bfloat16).reshape(Sk, nh, hd)   # (Sk, nh, hd)

    # Scores for all heads in one batched contraction (head axis is the batch
    # dim, contraction over hd; k consumed as-is, no explicit transpose).
    s = lax.dot_general(
        qh, kh,
        dimension_numbers=(((2,), (2,)), ((1,), (1,))),
        preferred_element_type=jnp.float32)            # (nh, tq, Sk) f32
    s = s * scale + mask[None, :, :]                   # in-kernel mask broadcast

    # Softmax in f32; reciprocal on the EUP.
    m = jnp.max(s, axis=-1, keepdims=True)
    e = jnp.exp(s - m)
    denom = jnp.sum(e, axis=-1, keepdims=True)
    p = e * pl.reciprocal(denom, approx=True)          # (nh, tq, Sk)

    # Context for all heads at once: batch over heads, contract over keys.
    ctx = lax.dot_general(
        p.astype(jnp.bfloat16), vh,
        dimension_numbers=(((2,), (0,)), ((0,), (1,))),
        preferred_element_type=jnp.float32)            # (nh, tq, hd)

    # Merge heads back to (tq, H) and run one full-depth output matmul.
    ctx2d = jnp.transpose(ctx.astype(jnp.bfloat16), (1, 0, 2)).reshape(tq, H)
    dense = jnp.dot(ctx2d, wo_ref[...],
                    preferred_element_type=jnp.float32) + bo_ref[...]

    out_ref[...] = _layernorm(dense + x, g_ref[...], beta_ref[...])


def bert_attention(q_in, kv_in, mask_rows, params, num_heads):
    """q_in: (B,Sq,H) f32, kv_in: (B,Sk,H) f32, mask_rows: (B,1,Sk) additive f32."""
    B, Sq, H = q_in.shape
    Sk = kv_in.shape[1]
    tq = _pick_tile(Sq, _ATTN_Q_TILE)
    nq = Sq // tq

    kernel = functools.partial(_attention_kernel, num_heads)

    def const2d(shape):
        return pl.BlockSpec(shape, lambda b, qi: (0, 0))

    return pl.pallas_call(
        kernel,
        out_shape=jax.ShapeDtypeStruct((B, Sq, H), jnp.float32),
        grid=(B, nq),
        in_specs=[
            pl.BlockSpec((None, tq, H), lambda b, qi: (b, qi, 0)),   # query/residual
            pl.BlockSpec((None, Sk, H), lambda b, qi: (b, 0, 0)),    # key/value input
            pl.BlockSpec((None, 1, Sk), lambda b, qi: (b, 0, 0)),    # additive mask
            const2d((H, H)), const2d((1, H)),    # query proj
            const2d((H, H)), const2d((1, H)),    # key proj
            const2d((H, H)), const2d((1, H)),    # value proj
            const2d((H, H)), const2d((1, H)),    # output dense
            const2d((1, H)), const2d((1, H)),    # layernorm gamma / beta
        ],
        out_specs=pl.BlockSpec((None, tq, H), lambda b, qi: (b, qi, 0)),
        compiler_params=pltpu.CompilerParams(
            dimension_semantics=("parallel", "parallel"),
            vmem_limit_bytes=_VMEM_LIMIT_BYTES),
    )(q_in, kv_in, mask_rows, *params)


# --------------------------------- FFN kernel --------------------------------
# BertIntermediate (dense + exact erf-GELU) + BertOutput (dense + residual + LN),
# tiled over (batch, seq-tile, intermediate-tile) with an f32 accumulator
# scratch over the intermediate axis.

def _ffn_kernel(x_ref, w1_ref, b1_ref, w2_ref, b2_ref, g_ref, beta_ref,
                out_ref, acc_ref):
    i = pl.program_id(2)

    @pl.when(i == 0)
    def _():
        acc_ref[...] = jnp.zeros_like(acc_ref)

    x = x_ref[...]                                               # (tS, H) f32
    h = jnp.dot(x.astype(jnp.bfloat16), w1_ref[...],
                preferred_element_type=jnp.float32) + b1_ref[...]   # (tS, tI)
    h = h * 0.5 * (1.0 + lax.erf(h * (1.0 / math.sqrt(2.0))))    # exact erf-GELU (f32)
    acc_ref[...] += jnp.dot(h.astype(jnp.bfloat16), w2_ref[...],
                            preferred_element_type=jnp.float32)  # (tS, H) f32

    @pl.when(i == pl.num_programs(2) - 1)
    def _():
        y = acc_ref[...] + b2_ref[...] + x                       # residual in f32
        out_ref[...] = _layernorm(y, g_ref[...], beta_ref[...])


def bert_ffn(x, params):
    w1, b1, w2, b2, gamma, beta = params
    B, S, H = x.shape
    I = w1.shape[1]
    tS = _pick_tile(S, _FFN_S_TILE)
    tI = _pick_tile(I, _FFN_I_TILE)

    return pl.pallas_call(
        _ffn_kernel,
        out_shape=jax.ShapeDtypeStruct((B, S, H), jnp.float32),
        grid=(B, S // tS, I // tI),
        in_specs=[
            pl.BlockSpec((None, tS, H), lambda b, s, i: (b, s, 0)),  # input / residual
            pl.BlockSpec((H, tI), lambda b, s, i: (0, i)),           # W1 column tile
            pl.BlockSpec((1, tI), lambda b, s, i: (0, i)),           # b1 tile
            pl.BlockSpec((tI, H), lambda b, s, i: (i, 0)),           # W2 row tile
            pl.BlockSpec((1, H), lambda b, s, i: (0, 0)),            # b2
            pl.BlockSpec((1, H), lambda b, s, i: (0, 0)),            # LN gamma
            pl.BlockSpec((1, H), lambda b, s, i: (0, 0)),            # LN beta
        ],
        out_specs=pl.BlockSpec((None, tS, H), lambda b, s, i: (b, s, 0)),
        scratch_shapes=[pltpu.VMEM((tS, H), jnp.float32)],
        compiler_params=pltpu.CompilerParams(
            dimension_semantics=("parallel", "parallel", "arbitrary"),
            vmem_limit_bytes=_VMEM_LIMIT_BYTES),
    )(x, w1, b1, w2, b2, gamma, beta)


# --------------------------------- BertLayer ----------------------------------

def bert_layer(hidden_states, attention_mask, params, num_heads):
    """BertLayer forward.

    hidden_states:  (B, S, H) f32
    attention_mask: (B, 1, 1, S) additive extended mask (BERT convention).
    params:         (attention_params, ffn_params) with matmul weights in bf16.
    """
    attn_p, ffn_p = params
    B, S, H = hidden_states.shape
    # Pass the mask as (B, 1, S); it is broadcast inside the kernel (no (B,S,S)
    # mask materialized in HBM).
    mask_rows = attention_mask.reshape(B, 1, S)
    attention_output = bert_attention(hidden_states, hidden_states, mask_rows,
                                      attn_p, num_heads)
    return bert_ffn(attention_output, ffn_p)


# ---------------------------- pure-JAX reference ------------------------------

def _ref_ln(x, g, b, eps=LN_EPS):
    u = x.mean(-1, keepdims=True)
    s = ((x - u) ** 2).mean(-1, keepdims=True)
    return g * ((x - u) / jnp.sqrt(s + eps)) + b


def _ref_attention(x, mask4, p, nh):
    wq, bq, wk, bk, wv, bv, wo, bo, g, beta = p
    B, S, H = x.shape
    hd = H // nh
    q = x @ wq + bq
    k = x @ wk + bk
    v = x @ wv + bv
    split = lambda t: t.reshape(B, S, nh, hd).transpose(0, 2, 1, 3)
    qh, kh, vh = split(q), split(k), split(v)
    s = jnp.einsum('bhqd,bhkd->bhqk', qh, kh) / math.sqrt(hd) + mask4
    pr = jax.nn.softmax(s, axis=-1)
    ctx = jnp.einsum('bhqk,bhkd->bhqd', pr, vh).transpose(0, 2, 1, 3).reshape(B, S, H)
    return _ref_ln(ctx @ wo + bo + x, g, beta)


def _ref_bert_layer(hidden, mask4, params, nh):
    attn_p, ffn_p = params
    a = _ref_attention(hidden, mask4, attn_p, nh)
    w1, b1, w2, b2, g, beta = ffn_p
    h = a @ w1 + b1
    h = h * 0.5 * (1.0 + lax.erf(h / math.sqrt(2.0)))
    return _ref_ln(h @ w2 + b2 + a, g, beta)


# ------------------------------- parameter init --------------------------------

def init_params(key, H, I):
    keys = iter(jax.random.split(key, 16))

    def lin(fan_in, fan_out):
        w = jax.random.normal(next(keys), (fan_in, fan_out), jnp.float32) * 0.02
        b = jax.random.normal(next(keys), (1, fan_out), jnp.float32) * 0.02
        return w, b

    wq, bq = lin(H, H)
    wk, bk = lin(H, H)
    wv, bv = lin(H, H)
    wo, bo = lin(H, H)
    attn_p = (wq, bq, wk, bk, wv, bv, wo, bo,
              jnp.ones((1, H), jnp.float32), jnp.zeros((1, H), jnp.float32))

    w1, b1 = lin(H, I)
    w2, b2 = lin(I, H)
    ffn_p = (w1, b1, w2, b2,
             jnp.ones((1, H), jnp.float32), jnp.zeros((1, H), jnp.float32))
    return attn_p, ffn_p


def cast_matmul_weights(params):
    """Cast [in,out] weight matrices to bf16 (halves HBM weight traffic); keep
    biases / LayerNorm params in f32."""
    return jax.tree_util.tree_map(
        lambda a: a.astype(jnp.bfloat16) if (a.ndim == 2 and a.shape[0] > 1) else a,
        params)


# ------------------------------------ main ------------------------------------

if __name__ == "__main__":
    # NOTE: toy shapes for the correctness check; real-BERT tuning should use
    # (8,128)-aligned S/H (the tile constants above kick in automatically).
    B, S, H, NH, INTER = 2, 8, 32, 4, 64

    key = jax.random.PRNGKey(0)
    k_h, k_p = jax.random.split(key, 2)

    hidden = jax.random.normal(k_h, (B, S, H), jnp.float32)

    # BERT-style extended attention mask (B,1,1,S): last key position masked out.
    mask_1d = jnp.where(jnp.arange(S) < S - 1, 0.0, -10000.0).astype(jnp.float32)
    attention_mask = jnp.broadcast_to(mask_1d[None, None, None, :], (B, 1, 1, S))

    params_f32 = init_params(k_p, H, INTER)
    params_kernel = cast_matmul_weights(params_f32)

    out = bert_layer(hidden, attention_mask, params_kernel, NH)
    out = jax.block_until_ready(out)

    ref = _ref_bert_layer(hidden, attention_mask, params_f32, NH)
    assert out.shape == (B, S, H)
    err = float(jnp.max(jnp.abs(out - ref)))
    # bf16 matmul operands + approx reciprocal vs. a pure-f32 reference.
    assert err < 2e-2, f"max abs err {err}"

    # TODO(synk): dropout layers are identity (eval mode); no RNG-based dropout
    # is implemented in the kernels.
    print("KERNEL_OK")
</pallas_src>

<mosaic_0001>
module attributes {stable_mosaic.version = 11 : i64} {
  func.func @_attention_kernel(%arg0: i32, %arg1: i32, %arg2: memref<1x8x32xf32, #tpu.memory_space<vmem>>, %arg3: memref<1x8x32xf32, #tpu.memory_space<vmem>>, %arg4: memref<1x1x8xf32, #tpu.memory_space<vmem>>, %arg5: memref<32x32xbf16, #tpu.memory_space<vmem>>, %arg6: memref<1x32xf32, #tpu.memory_space<vmem>>, %arg7: memref<32x32xbf16, #tpu.memory_space<vmem>>, %arg8: memref<1x32xf32, #tpu.memory_space<vmem>>, %arg9: memref<32x32xbf16, #tpu.memory_space<vmem>>, %arg10: memref<1x32xf32, #tpu.memory_space<vmem>>, %arg11: memref<32x32xbf16, #tpu.memory_space<vmem>>, %arg12: memref<1x32xf32, #tpu.memory_space<vmem>>, %arg13: memref<1x32xf32, #tpu.memory_space<vmem>>, %arg14: memref<1x32xf32, #tpu.memory_space<vmem>>, %arg15: memref<1x8x32xf32, #tpu.memory_space<vmem>>) attributes {dimension_semantics = [#tpu.dimension_semantics<parallel>, #tpu.dimension_semantics<parallel>], iteration_bounds = array<i64: 2, 1>, scalar_prefetch = 0 : i64, scratch_operands = 0 : i64, tpu.core_type = #tpu.core_type<tc>, window_params = [{transform_indices = @transform_0, window_bounds = array<i64: 1, 8, 32>}, {transform_indices = @transform_1, window_bounds = array<i64: 1, 8, 32>}, {transform_indices = @transform_2, window_bounds = array<i64: 1, 1, 8>}, {pipeline_mode = #tpu.pipeline_mode<synchronous>, transform_indices = @transform_3, window_bounds = array<i64: 32, 32>}, {pipeline_mode = #tpu.pipeline_mode<synchronous>, transform_indices = @transform_4, window_bounds = array<i64: 1, 32>}, {pipeline_mode = #tpu.pipeline_mode<synchronous>, transform_indices = @transform_5, window_bounds = array<i64: 32, 32>}, {pipeline_mode = #tpu.pipeline_mode<synchronous>, transform_indices = @transform_6, window_bounds = array<i64: 1, 32>}, {pipeline_mode = #tpu.pipeline_mode<synchronous>, transform_indices = @transform_7, window_bounds = array<i64: 32, 32>}, {pipeline_mode = #tpu.pipeline_mode<synchronous>, transform_indices = @transform_8, window_bounds = array<i64: 1, 32>}, {pipeline_mode = #tpu.pipeline_mode<synchronous>, transform_indices = @transform_9, window_bounds = array<i64: 32, 32>}, {pipeline_mode = #tpu.pipeline_mode<synchronous>, transform_indices = @transform_10, window_bounds = array<i64: 1, 32>}, {pipeline_mode = #tpu.pipeline_mode<synchronous>, transform_indices = @transform_11, window_bounds = array<i64: 1, 32>}, {pipeline_mode = #tpu.pipeline_mode<synchronous>, transform_indices = @transform_12, window_bounds = array<i64: 1, 32>}, {transform_indices = @transform_13, window_bounds = array<i64: 1, 8, 32>}]} {
    %c0 = arith.constant 0 : index
    %c0_0 = arith.constant 0 : index
    %c0_1 = arith.constant 0 : index
    %0 = vector.load %arg2[%c0, %c0_0, %c0_1] : memref<1x8x32xf32, #tpu.memory_space<vmem>>, vector<1x8x32xf32>
    %1 = vector.shape_cast %0 : vector<1x8x32xf32> to vector<8x32xf32>
    %c0_2 = arith.constant 0 : index
    %c0_3 = arith.constant 0 : index
    %c0_4 = arith.constant 0 : index
    %2 = vector.load %arg3[%c0_2, %c0_3, %c0_4] : memref<1x8x32xf32, #tpu.memory_space<vmem>>, vector<1x8x32xf32>
    %3 = vector.shape_cast %2 : vector<1x8x32xf32> to vector<8x32xf32>
    %c0_5 = arith.constant 0 : index
    %c0_6 = arith.constant 0 : index
    %c0_7 = arith.constant 0 : index
    %4 = vector.load %arg4[%c0_5, %c0_6, %c0_7] : memref<1x1x8xf32, #tpu.memory_space<vmem>>, vector<1x1x8xf32>
    %5 = vector.shape_cast %4 : vector<1x1x8xf32> to vector<1x8xf32>
    %6 = arith.truncf %1 : vector<8x32xf32> to vector<8x32xbf16>
    %7 = arith.truncf %3 : vector<8x32xf32> to vector<8x32xbf16>
    %c0_8 = arith.constant 0 : index
    %c0_9 = arith.constant 0 : index
    %8 = vector.load %arg5[%c0_8, %c0_9] : memref<32x32xbf16, #tpu.memory_space<vmem>>, vector<32x32xbf16>
    %cst = arith.constant dense<0.000000e+00> : vector<8x32xf32>
    %9 = tpu.matmul %6, %8, %cst {dimension_numbers = #tpu.dot_dimension_numbers<[1], [0], [0], [1], [0, 0, 1, 1], [], []>} : vector<8x32xbf16>, vector<32x32xbf16>, vector<8x32xf32> -> vector<8x32xf32>
    %c0_10 = arith.constant 0 : index
    %c0_11 = arith.constant 0 : index
    %10 = vector.load %arg6[%c0_10, %c0_11] : memref<1x32xf32, #tpu.memory_space<vmem>>, vector<1x32xf32>
    %11 = vector.broadcast %10 : vector<1x32xf32> to vector<8x32xf32>
    %12 = arith.addf %9, %11 : vector<8x32xf32>
    %c0_12 = arith.constant 0 : index
    %c0_13 = arith.constant 0 : index
    %13 = vector.load %arg7[%c0_12, %c0_13] : memref<32x32xbf16, #tpu.memory_space<vmem>>, vector<32x32xbf16>
    %cst_14 = arith.constant dense<0.000000e+00> : vector<8x32xf32>
    %14 = tpu.matmul %7, %13, %cst_14 {dimension_numbers = #tpu.dot_dimension_numbers<[1], [0], [0], [1], [0, 0, 1, 1], [], []>} : vector<8x32xbf16>, vector<32x32xbf16>, vector<8x32xf32> -> vector<8x32xf32>
    %c0_15 = arith.constant 0 : index
    %c0_16 = arith.constant 0 : index
    %15 = vector.load %arg8[%c0_15, %c0_16] : memref<1x32xf32, #tpu.memory_space<vmem>>, vector<1x32xf32>
    %16 = vector.broadcast %15 : vector<1x32xf32> to vector<8x32xf32>
    %17 = arith.addf %14, %16 : vector<8x32xf32>
    %c0_17 = arith.constant 0 : index
    %c0_18 = arith.constant 0 : index
    %18 = vector.load %arg9[%c0_17, %c0_18] : memref<32x32xbf16, #tpu.memory_space<vmem>>, vector<32x32xbf16>
    %cst_19 = arith.constant dense<0.000000e+00> : vector<8x32xf32>
    %19 = tpu.matmul %7, %18, %cst_19 {dimension_numbers = #tpu.dot_dimension_numbers<[1], [0], [0], [1], [0, 0, 1, 1], [], []>} : vector<8x32xbf16>, vector<32x32xbf16>, vector<8x32xf32> -> vector<8x32xf32>
    %c0_20 = arith.constant 0 : index
    %c0_21 = arith.constant 0 : index
    %20 = vector.load %arg10[%c0_20, %c0_21] : memref<1x32xf32, #tpu.memory_space<vmem>>, vector<1x32xf32>
    %21 = vector.broadcast %20 : vector<1x32xf32> to vector<8x32xf32>
    %22 = arith.addf %19, %21 : vector<8x32xf32>
    %23 = arith.truncf %12 : vector<8x32xf32> to vector<8x32xbf16>
    %24 = vector.shape_cast %23 : vector<8x32xbf16> to vector<8x4x8xbf16>
    %25 = arith.truncf %17 : vector<8x32xf32> to vector<8x32xbf16>
    %26 = vector.shape_cast %25 : vector<8x32xbf16> to vector<8x4x8xbf16>
    %27 = arith.truncf %22 : vector<8x32xf32> to vector<8x32xbf16>
    %28 = vector.shape_cast %27 : vector<8x32xbf16> to vector<8x4x8xbf16>
    %cst_22 = arith.constant dense<0.000000e+00> : vector<4x8x8xf32>
    %29 = tpu.matmul %24, %26, %cst_22 {dimension_numbers = #tpu.dot_dimension_numbers<[2], [2], [0], [0], [0, 1, 0, 0, 1, 0], [1], [1]>} : vector<8x4x8xbf16>, vector<8x4x8xbf16>, vector<4x8x8xf32> -> vector<4x8x8xf32>
    %cst_23 = arith.constant 0.353553385 : f32
    %30 = vector.broadcast %cst_23 : f32 to vector<4x8x8xf32>
    %31 = arith.mulf %29, %30 : vector<4x8x8xf32>
    %32 = vector.shape_cast %5 : vector<1x8xf32> to vector<1x1x8xf32>
    %33 = vector.broadcast %32 : vector<1x1x8xf32> to vector<4x8x8xf32>
    %34 = arith.addf %31, %33 : vector<4x8x8xf32>
    %cst_24 = arith.constant dense<0xFF800000> : vector<4x8xf32>
    %35 = vector.multi_reduction <maximumf>, %34, %cst_24 [2] : vector<4x8x8xf32> to vector<4x8xf32>
    %36 = vector.shape_cast %35 : vector<4x8xf32> to vector<4x8x1xf32>
    %37 = vector.broadcast %36 : vector<4x8x1xf32> to vector<4x8x8xf32>
    %38 = arith.subf %34, %37 : vector<4x8x8xf32>
    %39 = math.exp %38 : vector<4x8x8xf32>
    %cst_25 = arith.constant dense<0.000000e+00> : vector<4x8xf32>
    %40 = vector.multi_reduction <add>, %39, %cst_25 [2] : vector<4x8x8xf32> to vector<4x8xf32>
    %41 = vector.shape_cast %40 : vector<4x8xf32> to vector<4x8x1xf32>
    %42 = tpu.reciprocal %41 {approx = true} : vector<4x8x1xf32> -> vector<4x8x1xf32>
    %43 = vector.broadcast %42 : vector<4x8x1xf32> to vector<4x8x8xf32>
    %44 = arith.mulf %39, %43 : vector<4x8x8xf32>
    %45 = arith.truncf %44 : vector<4x8x8xf32> to vector<4x8x8xbf16>
    %cst_26 = arith.constant dense<0.000000e+00> : vector<4x8x8xf32>
    %46 = tpu.matmul %45, %28, %cst_26 {dimension_numbers = #tpu.dot_dimension_numbers<[2], [0], [1], [2], [0, 0, 0, 1, 1, 2], [0], [1]>} : vector<4x8x8xbf16>, vector<8x4x8xbf16>, vector<4x8x8xf32> -> vector<4x8x8xf32>
    %47 = arith.truncf %46 : vector<4x8x8xf32> to vector<4x8x8xbf16>
    %48 = tpu.transpose %47, [1, 0, 2] : vector<4x8x8xbf16> -> vector<8x4x8xbf16>
    %49 = vector.shape_cast %48 : vector<8x4x8xbf16> to vector<8x32xbf16>
    %c0_27 = arith.constant 0 : index
    %c0_28 = arith.constant 0 : index
    %50 = vector.load %arg11[%c0_27, %c0_28] : memref<32x32xbf16, #tpu.memory_space<vmem>>, vector<32x32xbf16>
    %cst_29 = arith.constant dense<0.000000e+00> : vector<8x32xf32>
    %51 = tpu.matmul %49, %50, %cst_29 {dimension_numbers = #tpu.dot_dimension_numbers<[1], [0], [0], [1], [0, 0, 1, 1], [], []>} : vector<8x32xbf16>, vector<32x32xbf16>, vector<8x32xf32> -> vector<8x32xf32>
    %c0_30 = arith.constant 0 : index
    %c0_31 = arith.constant 0 : index
    %52 = vector.load %arg12[%c0_30, %c0_31] : memref<1x32xf32, #tpu.memory_space<vmem>>, vector<1x32xf32>
    %53 = vector.broadcast %52 : vector<1x32xf32> to vector<8x32xf32>
    %54 = arith.addf %51, %53 : vector<8x32xf32>
    %55 = arith.addf %54, %1 : vector<8x32xf32>
    %c0_32 = arith.constant 0 : index
    %c0_33 = arith.constant 0 : index
    %56 = vector.load %arg13[%c0_32, %c0_33] : memref<1x32xf32, #tpu.memory_space<vmem>>, vector<1x32xf32>
    %c0_34 = arith.constant 0 : index
    %c0_35 = arith.constant 0 : index
    %57 = vector.load %arg14[%c0_34, %c0_35] : memref<1x32xf32, #tpu.memory_space<vmem>>, vector<1x32xf32>
    %cst_36 = arith.constant dense<0.000000e+00> : vector<8xf32>
    %58 = vector.multi_reduction <add>, %55, %cst_36 [1] : vector<8x32xf32> to vector<8xf32>
    %59 = vector.shape_cast %58 : vector<8xf32> to vector<8x1xf32>
    %cst_37 = arith.constant 3.200000e+01 : f32
    %60 = vector.broadcast %cst_37 : f32 to vector<8x1xf32>
    %61 = arith.divf %59, %60 : vector<8x1xf32>
    %62 = vector.broadcast %61 : vector<8x1xf32> to vector<8x32xf32>
    %63 = arith.subf %55, %62 : vector<8x32xf32>
    %64 = arith.mulf %63, %63 : vector<8x32xf32>
    %cst_38 = arith.constant dense<0.000000e+00> : vector<8xf32>
    %65 = vector.multi_reduction <add>, %64, %cst_38 [1] : vector<8x32xf32> to vector<8xf32>
    %66 = vector.shape_cast %65 : vector<8xf32> to vector<8x1xf32>
    %cst_39 = arith.constant 3.200000e+01 : f32
    %67 = vector.broadcast %cst_39 : f32 to vector<8x1xf32>
    %68 = arith.divf %66, %67 : vector<8x1xf32>
    %69 = vector.broadcast %61 : vector<8x1xf32> to vector<8x32xf32>
    %70 = arith.subf %55, %69 : vector<8x32xf32>
    %cst_40 = arith.constant 9.99999996E-13 : f32
    %71 = vector.broadcast %cst_40 : f32 to vector<8x1xf32>
    %72 = arith.addf %68, %71 : vector<8x1xf32>
    %73 = math.sqrt %72 : vector<8x1xf32>
    %74 = vector.broadcast %73 : vector<8x1xf32> to vector<8x32xf32>
    %75 = arith.divf %70, %74 : vector<8x32xf32>
    %76 = vector.broadcast %56 : vector<1x32xf32> to vector<8x32xf32>
    %77 = arith.mulf %76, %75 : vector<8x32xf32>
    %78 = vector.broadcast %57 : vector<1x32xf32> to vector<8x32xf32>
    %79 = arith.addf %77, %78 : vector<8x32xf32>
    %c0_41 = arith.constant 0 : index
    %c0_42 = arith.constant 0 : index
    %c0_43 = arith.constant 0 : index
    %80 = vector.load %arg15[%c0_41, %c0_42, %c0_43] : memref<1x8x32xf32, #tpu.memory_space<vmem>>, vector<1x8x32xf32>
    %81 = vector.shape_cast %80 : vector<1x8x32xf32> to vector<8x32xf32>
    %82 = vector.shape_cast %79 : vector<8x32xf32> to vector<1x8x32xf32>
    tpu.vector_store %arg15[%c0_41, %c0_42, %c0_43], %82 {strides = array<i32>} : memref<1x8x32xf32, #tpu.memory_space<vmem>>, vector<1x8x32xf32>,
    return
  }
  func.func @transform_0(%arg0: i32, %arg1: i32) -> (i32, i32, i32) {
    %c0_i32 = arith.constant 0 : i32
    %c0_i32_0 = arith.constant 0 : i32
    return %arg0, %arg1, %c0_i32 : i32, i32, i32
  }
  func.func @transform_1(%arg0: i32, %arg1: i32) -> (i32, i32, i32) {
    %c0_i32 = arith.constant 0 : i32
    %c0_i32_0 = arith.constant 0 : i32
    %c0_i32_1 = arith.constant 0 : i32
    return %arg0, %c0_i32, %c0_i32_0 : i32, i32, i32
  }
  func.func @transform_2(%arg0: i32, %arg1: i32) -> (i32, i32, i32) {
    %c0_i32 = arith.constant 0 : i32
    %c0_i32_0 = arith.constant 0 : i32
    %c0_i32_1 = arith.constant 0 : i32
    return %arg0, %c0_i32, %c0_i32_0 : i32, i32, i32
  }
  func.func @transform_3(%arg0: i32, %arg1: i32) -> (i32, i32) {
    %c0_i32 = arith.constant 0 : i32
    %c0_i32_0 = arith.constant 0 : i32
    %c0_i32_1 = arith.constant 0 : i32
    return %c0_i32, %c0_i32_0 : i32, i32
  }
  func.func @transform_4(%arg0: i32, %arg1: i32) -> (i32, i32) {
    %c0_i32 = arith.constant 0 : i32
    %c0_i32_0 = arith.constant 0 : i32
    %c0_i32_1 = arith.constant 0 : i32
    return %c0_i32, %c0_i32_0 : i32, i32
  }
  func.func @transform_5(%arg0: i32, %arg1: i32) -> (i32, i32) {
    %c0_i32 = arith.constant 0 : i32
    %c0_i32_0 = arith.constant 0 : i32
    %c0_i32_1 = arith.constant 0 : i32
    return %c0_i32, %c0_i32_0 : i32, i32
  }
  func.func @transform_6(%arg0: i32, %arg1: i32) -> (i32, i32) {
    %c0_i32 = arith.constant 0 : i32
    %c0_i32_0 = arith.constant 0 : i32
    %c0_i32_1 = arith.constant 0 : i32
    return %c0_i32, %c0_i32_0 : i32, i32
  }
  func.func @transform_7(%arg0: i32, %arg1: i32) -> (i32, i32) {
    %c0_i32 = arith.constant 0 : i32
    %c0_i32_0 = arith.constant 0 : i32
    %c0_i32_1 = arith.constant 0 : i32
    return %c0_i32, %c0_i32_0 : i32, i32
  }
  func.func @transform_8(%arg0: i32, %arg1: i32) -> (i32, i32) {
    %c0_i32 = arith.constant 0 : i32
    %c0_i32_0 = arith.constant 0 : i32
    %c0_i32_1 = arith.constant 0 : i32
    return %c0_i32, %c0_i32_0 : i32, i32
  }
  func.func @transform_9(%arg0: i32, %arg1: i32) -> (i32, i32) {
    %c0_i32 = arith.constant 0 : i32
    %c0_i32_0 = arith.constant 0 : i32
    %c0_i32_1 = arith.constant 0 : i32
    return %c0_i32, %c0_i32_0 : i32, i32
  }
  func.func @transform_10(%arg0: i32, %arg1: i32) -> (i32, i32) {
    %c0_i32 = arith.constant 0 : i32
    %c0_i32_0 = arith.constant 0 : i32
    %c0_i32_1 = arith.constant 0 : i32
    return %c0_i32, %c0_i32_0 : i32, i32
  }
  func.func @transform_11(%arg0: i32, %arg1: i32) -> (i32, i32) {
    %c0_i32 = arith.constant 0 : i32
    %c0_i32_0 = arith.constant 0 : i32
    %c0_i32_1 = arith.constant 0 : i32
    return %c0_i32, %c0_i32_0 : i32, i32
  }
  func.func @transform_12(%arg0: i32, %arg1: i32) -> (i32, i32) {
    %c0_i32 = arith.constant 0 : i32
    %c0_i32_0 = arith.constant 0 : i32
    %c0_i32_1 = arith.constant 0 : i32
    return %c0_i32, %c0_i32_0 : i32, i32
  }
  func.func @transform_13(%arg0: i32, %arg1: i32) -> (i32, i32, i32) {
    %c0_i32 = arith.constant 0 : i32
    %c0_i32_0 = arith.constant 0 : i32
    return %arg0, %arg1, %c0_i32 : i32, i32, i32
  }
}

</mosaic_0001>

<bundles_post_ra>
// kernel: tpu_custom_call.1
= control target key start
LH: loop header
LB: loop body
LE: loop exit
PB: predicated region body
PF: predicated region fallthrough
CT: control target
= control target key end

     0   :  { %s2957_s0 = inlined_call_operand.hbm [shape: f32[2,8,32], index: 0, kind: input, shape index: {}]   ;;  %s2958_s1 = inlined_call_operand.hbm [shape: f32[2,8,32], index: 1, kind: input, shape index: {}]   ;;  %s2959_s2 = inlined_call_operand.hbm [shape: f32[2,1,8], index: 2, kind: input, shape index: {}]   ;;  %s2960_s3 = inlined_call_operand.hbm [shape: bf16[32,32], index: 3, kind: input, shape index: {}]   ;;  %s2961_s4 = inlined_call_operand.hbm [shape: f32[1,32], index: 4, kind: input, shape index: {}]   ;;  %s2962_s5 = inlined_call_operand.hbm [shape: bf16[32,32], index: 5, kind: input, shape index: {}]   ;;  %s2963_s6 = inlined_call_operand.hbm [shape: f32[1,32], index: 6, kind: input, shape index: {}]   ;;  %s2964_s7 = inlined_call_operand.hbm [shape: bf16[32,32], index: 7, kind: input, shape index: {}]   ;;  %s2965_s8 = inlined_call_operand.hbm [shape: f32[1,32], index: 8, kind: input, shape index: {}]   ;;  %s2966_s9 = inlined_call_operand.vmem [shape: bf16[32,32], index: 9, kind: input, shape index: {}]   ;;  %s2967_s10 = inlined_call_operand.vmem [shape: f32[1,32], index: 10, kind: input, shape index: {}]   ;;  %s2968_s11 = inlined_call_operand.vmem [shape: f32[1,32], index: 11, kind: input, shape index: {}]   ;;  %s2969_s12 = inlined_call_operand.vmem [shape: f32[1,32], index: 12, kind: input, shape index: {}]   ;;  %s2970_s13 = inlined_call_operand.hbm [shape: f32[2,8,32], index: 13, kind: output, shape index: {}]  }
   0x1   :  { %2987 = sst [smem:[#allocation32_spill]] %s2960_s3 }
   0x2   :  { %2988 = sst [smem:[#allocation33_spill]] %s2962_s5 }
   0x3   :  { %2989 = sst [smem:[#allocation34_spill]] %s2964_s7 }
   0x4   :  { %2990 = sst [smem:[#allocation35_spill]] %s2968_s11 }
   0x5   :  { %2991 = sst [smem:[#allocation36_spill]] %s2969_s12 }
   0x6   :  { %2992 = sst [smem:[#allocation37_spill]] %s2970_s13 }
   0x7   :  { %18 = vsyncpa [#allocation3], 0 }
   0x8   :  { %20 = vsyncpa [#allocation3 + $0x1], 0 }
   0x9   :  { %21 = vsyncpa [#allocation6], 0 }
   0xa   :  { %23 = vsyncpa [#allocation6 + $0x1], 0 }
   0xb   :  { %24 = vsyncpa [#allocation9], 0 }
   0xc   :  { %25 = vsyncpa [#allocation12], 0 }
   0xd   :  { %26 = vsyncpa [#allocation15], 0 }
   0xe   :  { %27 = vsyncpa [#allocation4], 0 }
   0xf   :  { %29 = vsyncpa [#allocation4 + $0x1], 0  ;;  %s2589_s25 = smov 0   ;;  %s2591_s26 = smov 0  }
  0x10   :  { %s2593_s27 = smov 0   ;;  %s2595_s28 = smov 0  }
  0x11   :  { %s2597_s29 = smov 0   ;;  %s2599_s30 = smov 0  }
  0x12 LB: > { %2993 = sst [smem:[#allocation24_spill]] %s2474_s25  ;;  %s2620_s14 = sadd.s32 4294967295, %s2494_s30   ;;  %s2494_s30 = sphi %s2599_s30, %s35_s30   ;;  %s2490_s29 = sphi %s2597_s29, %s3042_s29   ;;  %s2486_s28 = sphi %s2595_s28, %s3041_s28   ;;  %s2482_s27 = sphi %s2593_s27, %s3037_s27   ;;  %s2478_s26 = sphi %s2591_s26, %s3040_s26   ;;  %s2474_s25 = sphi %s2589_s25, %s3039_s25  }
  0x13   : > { %2994 = sst [smem:[#allocation25_spill]] %s2482_s27  ;;  %p1822_p0 = scmp.ge.s32.totalorder %s2494_s30, 1 }
  0x14   : > { %2995 = sst [smem:[#allocation26_spill]] %s2486_s28  ;;  %p2972_p1 = scmp.eq.s32.totalorder %s2620_s14, 0 }
  0x15   : > { %2996 = sst [smem:[#allocation27_spill]] %s2494_s30  ;;  %p370_p2 = scmp.lt.s32.totalorder %s2494_s30, 3 }
  0x16   : > { %s2496_s16 = smov [#allocation8]   ;;  %s2497_s19 = smov [#allocation11]  }
  0x17   : > { %p2625_p3 = pnand %p1822_p0, %p370_p2  ;;  %s382_s17 = sshll.u32 %s2496_s16, 4  ;;  %s383_s17 = int_to_ptr.vmem [resolvable:$true] %s382_s17 }
  0x18   : > { %s406_s20 = sshll.u32 %s2497_s19, 4  ;;  %s2498_s21 = smov [#allocation14]   ;;  %s407_s20 = int_to_ptr.vmem [resolvable:$true] %s406_s20 }
  0x19   : > { %s2997_s15 = scalar_select %p2625_p3, 1, 0 }
  0x1a   : > { %p2016_p4 = pneg %p2625_p3  ;;  %s430_s22 = sshll.u32 %s2498_s21, 4  ;;  %s431_s22 = int_to_ptr.vmem [resolvable:$true] %s430_s22 }
  0x1b   : > { %s2169_s24 = scalar_lea.vmem %s383_s17, 256  ;;  %p2177_p11 = scmp.lt.s32.totalorder %s383_s17, %s383_s17 }
  0x1c   : > { %p2634_p6 = pnand %p2016_p4, %p2972_p1  ;;  %p2170_p8 = scmp.ne.s32.totalorder %s383_s17, %s2169_s24 }
  0x1d   : > { %p2178_p12 = scmp.lt.s32.totalorder %s2169_s24, %s2169_s24 }
  0x1e   : > { %s2998_s18 = scalar_select %p2634_p6, 1, 0 }
  0x1f   : > { %p2640_p7 = pneg %p2634_p6  ;;  %p2179_p13 = por %p2178_p12, %p2177_p11 }
  0x21   : > { %p2172_p9 = pnand %p2170_p8, %p2640_p7 }
  0x23   : > { %p2173_p10 = pneg %p2172_p9 }
  0x25   : > { %p2180_p0 = pnand %p2179_p13, %p2173_p10 }
  0x27   : > { %2183 = shalt.err (!%p2180_p0)
}
  0x28   : > { %s2499_s16 = smov 64   ;;  %s2500_s19 = smov 4  }
  0x29   : > { %s3000_s3 = sld [smem:[#allocation32_spill]]  ;;  %s2195_s12 = scalar_lea.vmem %s407_s20, 256 }
  0x2a   : > { %p2196_p2 = scmp.ne.s32.totalorder %s407_s20, %s2195_s12  ;;  %p2203_p9 = scmp.lt.s32.totalorder %s407_s20, %s407_s20 }
  0x2b   : > { %p2204_p5 = scmp.lt.s32.totalorder %s2195_s12, %s2195_s12 }
  0x2c   : > { %p2198_p4 = pnand %p2196_p2, %p2640_p7 }
  0x2d   : > { %p2205_p1 = por %p2204_p5, %p2203_p9 }
  0x2e   : > { %p2199_p8 = pneg %p2198_p4 }
  0x2f   : > { %2019 = dma.hbm_to_vmem [thread:$0]  (!%p2634_p6), %s3000_s3, 256, %s383_s17, [#allocation9], %s2499_s16, %s2499_s16, %s2500_s19  }
  0x30   : > { %p2206_p11 = pnand %p2205_p1, %p2199_p8 }
  0x32   : > { %2209 = shalt.err (!%p2206_p11)
}
  0x33   : > { %s3001_s5 = sld [smem:[#allocation33_spill]]  ;;  %s2221_s13 = scalar_lea.vmem %s431_s22, 256 }
  0x34   : > { %p2222_p10 = scmp.ne.s32.totalorder %s431_s22, %s2221_s13  ;;  %p2229_p0 = scmp.lt.s32.totalorder %s431_s22, %s431_s22 }
  0x35   : > { %p2230_p2 = scmp.lt.s32.totalorder %s2221_s13, %s2221_s13 }
  0x36   : > { %p2224_p12 = pnand %p2222_p10, %p2640_p7 }
  0x37   : > { %p2231_p4 = por %p2230_p2, %p2229_p0 }
  0x38   : > { %p2225_p13 = pneg %p2224_p12 }
  0x39   : > { %2025 = dma.hbm_to_vmem [thread:$0]  (!%p2634_p6), %s3001_s5, 256, %s407_s20, [#allocation12], %s2499_s16, %s2499_s16, %s2500_s19  }
  0x3a   : > { %p2232_p3 = pnand %p2231_p4, %p2225_p13 }
  0x3c   : > { %2235 = shalt.err (!%p2232_p3)
}
  0x3d   : > { %s3002_s7 = sld [smem:[#allocation34_spill]]  ;;  %s1821_s11 = sadd.s32 4294967294, %s2494_s30  }
  0x3e   : > { %s47_s20 = sadd.s32 1, %s2490_s29  ;;  %s56_s21 = sadd.s32 1, %s2482_s27 }
  0x3f   : > { %p49_p1 = scmp.ge.s32.totalorder %s47_s20, 2  ;;  %p63_p3 = scmp.ne.s32.totalorder %s2482_s27, %s2478_s26 }
  0x40   : > { %p64_p5 = scmp.eq.s32.totalorder %s2494_s30, 0  ;;  %p69_p8 = scmp.ne.s32.totalorder %s2478_s26, %s2474_s25 }
  0x41   : > { %s3044_s20 = smov (%p49_p1, %s47_s20), 0  ;;  %p3005_p11 = scmp.eq.s32.totalorder %s2620_s14, 0 }
  0x42   : > { %3003 = sst [smem:[#allocation28_spill]] %s3044_s20  ;;  %p2675_p9 = por %p64_p5, %p63_p3 }
  0x43   : > { %2031 = dma.hbm_to_vmem [thread:$0]  (!%p2634_p6), %s3002_s7, 256, %s431_s22, [#allocation15], %s2499_s16, %s2499_s16, %s2500_s19  }
  0x44   : > { %p2681_p10 = por %p3005_p11, %p69_p8  ;;  %s51_s16 = ssub.s32 %s2490_s29, %s3044_s20 }
  0x45   : > { %p357_p12 = scmp.eq.s32.totalorder %s2620_s14, 1  ;;  %p54_p13 = scmp.eq.s32.totalorder %s51_s16, 0 }
  0x46   : > { %s3006_s22 = scalar_select %p2681_p10, 1, 0 }
  0x47   : > { %p363_p0 = scmp.eq.s32.totalorder %s1821_s11, 1  ;;  %p2688_p2 = por %p357_p12, %p63_p3 }
  0x48   : > { %p2055_p4 = scmp.lt.s32.totalorder %s2494_s30, 2  ;;  %s2701_s17 = sand.u32 1, %s2482_s27  }
  0x49   : > { %s3007_s19 = scalar_select %p2688_p2, 1, 0 }
  0x4a   : > { %s2694_s13 = scalar_select %p54_p13, %s2482_s27, %s56_s21  }
  0x4b   : > { %3008 = sst [smem:[#allocation29_spill]] %s3007_s19  ;;  %p2696_p1 = por %p363_p0, %p69_p8 }
  0x4c   : > { %3009 = sst [smem:[#allocation30_spill]] %s2694_s13  ;;  %s1830_s3 = sshll.u32 %s2701_s17, 3 }
  0x4d   : > { %s3010_s12 = scalar_select %p2696_p1, 1, 0 }
  0x4e   : > { %s1831_s5 = sshll.u32 %s2490_s29, 7  ;;  %p2707_p5 = pnand %p2055_p4, %p2675_p9 }
  0x4f   : > { %3011 = sst [smem:[#allocation31_spill]] %s3010_s12  ;;  %s486_s16 = sand.u32 1, %s2494_s30  }
  0x50   : > { %s495_s20 = scalar_lea.hbm %s2958_s1, %s1831_s5  ;;  %s490_s13 = scalar_lea.vmem [#allocation5], %s1830_s3 }
  0x51   : > { %s497_s27 = sshll.u32 %s490_s13, 4  ;;  %s2501_s12 = smov [#allocation10]   ;;  %s498_s27 = int_to_ptr.vmem [resolvable:$true] %s497_s27 }
  0x52   : > { %s396_s25 = sshll.u32 %s2501_s12, 4  ;;  %s2719_s19 = scalar_lea.sflag [#allocation6], %s486_s16  ;;  %s397_s25 = int_to_ptr.vmem [resolvable:$true] %s396_s25 }
  0x53   : > { %p2982_p3 = pneg %p2707_p5  ;;  %s2249_s24 = scalar_lea.vmem %s498_s27, 128 }
  0x54   : > { %p2250_p8 = scmp.ne.s32.totalorder %s498_s27, %s2249_s24  ;;  %s2502_s30 = smov [#allocation5]  }
  0x55   : > { %s2254_s28 = sshll.u32 %s2502_s30, 4  ;;  %s2255_s28 = int_to_ptr.vmem [resolvable:$false] %s2254_s28 }
  0x56   : > { %p2252_p9 = pnand %p2250_p8, %p2982_p3  ;;  %s2256_s7 = scalar_lea.vmem %s2255_s28, 256 }
  0x57   : > { %p2257_p12 = scmp.lt.s32.totalorder %s498_s27, %s2255_s28  ;;  %p2258_p13 = scmp.lt.s32.totalorder %s2256_s7, %s2249_s24 }
  0x58   : > { %p2253_p11 = pneg %p2252_p9 }
  0x59   : > { %p2259_p0 = por %p2258_p13, %p2257_p12 }
  0x5b   : > { %p2260_p4 = pnand %p2259_p0, %p2253_p11 }
  0x5d   : > { %2263 = shalt.err (!%p2260_p4)
}
  0x5e   : > { %2041 = dma.hbm_to_vmem [thread:$0]  (!%p2707_p5), %s495_s20, 128, %s498_s27, %s2719_s19  }
  0x5f   : > { %s2275_s13 = scalar_lea.vmem %s397_s25, 16  ;;  %s2282_s12 = scalar_lea.vmem %s397_s25, 32 }
  0x60   : > { %p2276_p1 = scmp.ne.s32.totalorder %s397_s25, %s2275_s13  ;;  %p2283_p3 = scmp.lt.s32.totalorder %s397_s25, %s397_s25 }
  0x61   : > { %p2284_p2 = scmp.lt.s32.totalorder %s2282_s12, %s2275_s13 }
  0x62   : > { %p2278_p8 = pnand %p2276_p1, %p2640_p7 }
  0x63   : > { %p2285_p10 = por %p2284_p2, %p2283_p3 }
  0x64   : > { %p2279_p9 = pneg %p2278_p8 }
  0x66   : > { %p2286_p6 = pnand %p2285_p10, %p2279_p9 }
  0x68   : > { %2289 = shalt.err (!%p2286_p6)
}
  0x69   : > { %p3013_p11 = scmp.ne.s32.totalorder %s2998_s18, 0  ;;  %s2503_s27 = smov [#allocation13]  }
  0x6a   : > { %s420_s20 = sshll.u32 %s2503_s27, 4  ;;  %s2504_s16 = smov [#allocation16]   ;;  %s421_s20 = int_to_ptr.vmem [resolvable:$true] %s420_s20 }
  0x6b   : > { %2022 = dma.hbm_to_vmem [thread:$0]  (!%p3013_p11), %s2961_s4, 16, %s397_s25, [#allocation9]  }
  0x6c   : > { %s444_s21 = sshll.u32 %s2504_s16, 4  ;;  %s2301_s24 = scalar_lea.vmem %s421_s20, 16  ;;  %s445_s21 = int_to_ptr.vmem [resolvable:$true] %s444_s21 }
  0x6d   : > { %p2302_p1 = scmp.ne.s32.totalorder %s421_s20, %s2301_s24  ;;  %s2308_s7 = scalar_lea.vmem %s421_s20, 32 }
  0x6e   : > { %p2309_p10 = scmp.lt.s32.totalorder %s421_s20, %s421_s20  ;;  %p2310_p6 = scmp.lt.s32.totalorder %s2308_s7, %s2301_s24 }
  0x6f   : > { %p2304_p12 = pnand %p2302_p1, %p2640_p7 }
  0x70   : > { %p2311_p2 = por %p2310_p6, %p2309_p10 }
  0x71   : > { %p2305_p13 = pneg %p2304_p12 }
  0x73   : > { %p2312_p3 = pnand %p2311_p2, %p2305_p13 }
  0x75   : > { %2315 = shalt.err (!%p2312_p3)
}
  0x76   : > { %2028 = dma.hbm_to_vmem [thread:$0]  (!%p3013_p11), %s2963_s6, 16, %s421_s20, [#allocation12]  }
  0x77   : > { %s2327_s12 = scalar_lea.vmem %s445_s21, 16  ;;  %s2334_s28 = scalar_lea.vmem %s445_s21, 32 }
  0x78   : > { %p2328_p0 = scmp.ne.s32.totalorder %s445_s21, %s2327_s12  ;;  %p2335_p9 = scmp.lt.s32.totalorder %s445_s21, %s445_s21 }
  0x79   : > { %p2336_p1 = scmp.lt.s32.totalorder %s2334_s28, %s2327_s12 }
  0x7a   : > { %p2330_p4 = pnand %p2328_p0, %p2640_p7 }
  0x7b   : > { %p2337_p12 = por %p2336_p1, %p2335_p9 }
  0x7c   : > { %p2331_p8 = pneg %p2330_p4 }
  0x7e   : > { %p2338_p10 = pnand %p2337_p12, %p2331_p8 }
  0x80   : > { %2341 = shalt.err (!%p2338_p10)
}
  0x81   : > { %2034 = dma.hbm_to_vmem [thread:$0]  (!%p3013_p11), %s2965_s8, 16, %s445_s21, [#allocation15]  }
  0x82   : > { %s477_s16 = scalar_lea.hbm %s2957_s0, %s1831_s5  ;;  %s471_s24 = scalar_lea.vmem [#allocation2], %s1830_s3 }
  0x83   : > { %s479_s7 = sshll.u32 %s471_s24, 4  ;;  %s1834_s13 = sshll.u32 %s2490_s29, 4  ;;  %s480_s7 = int_to_ptr.vmem [resolvable:$true] %s479_s7 }
  0x84   : > { %s468_s18 = scalar_lea.sflag [#allocation3], %s2701_s17  ;;  %s2355_s25 = scalar_lea.vmem %s480_s7, 128 }
  0x85   : > { %p2356_p7 = scmp.ne.s32.totalorder %s480_s7, %s2355_s25  ;;  %p3014_p13 = pneg %p2707_p5 }
  0x86   : > { %s2505_s12 = smov [#allocation2]  }
  0x87   : > { %p2358_p6 = pnand %p2356_p7, %p3014_p13  ;;  %s2360_s28 = sshll.u32 %s2505_s12, 4  ;;  %s2361_s28 = int_to_ptr.vmem [resolvable:$false] %s2360_s28 }
  0x88   : > { %s2362_s21 = scalar_lea.vmem %s2361_s28, 256  ;;  %p2363_p11 = scmp.lt.s32.totalorder %s480_s7, %s2361_s28 }
  0x89   : > { %p2359_p2 = pneg %p2358_p6  ;;  %p2364_p3 = scmp.lt.s32.totalorder %s2362_s21, %s2355_s25 }
  0x8b   : > { %p2365_p0 = por %p2364_p3, %p2363_p11 }
  0x8d   : > { %p2366_p4 = pnand %p2365_p0, %p2359_p2 }
  0x8f   : > { %2369 = shalt.err (!%p2366_p4)
}
  0x90   : > { %2038 = dma.hbm_to_vmem [thread:$0]  (!%p2707_p5), %s477_s16, 128, %s480_s7, %s468_s18  }
  0x91   : > { %s512_s30 = scalar_lea.hbm %s2959_s2, %s1834_s13  ;;  %s507_s27 = scalar_lea.vmem [#allocation7], %s2701_s17 }
  0x92   : > { %s514_s23 = sshll.u32 %s507_s27, 4  ;;  %p3015_p9 = pmov %p3014_p13  ;;  %s515_s23 = int_to_ptr.vmem [resolvable:$true] %s514_s23 }
  0x93   : > { %s2383_s20 = scalar_lea.vmem %s515_s23, 16  ;;  %s2506_s24 = smov [#allocation7]  }
  0x94   : > { %p2384_p8 = scmp.ne.s32.totalorder %s515_s23, %s2383_s20  ;;  %s2388_s25 = sshll.u32 %s2506_s24, 4  ;;  %s2389_s25 = int_to_ptr.vmem [resolvable:$false] %s2388_s25 }
  0x95   : > { %s2390_s12 = scalar_lea.vmem %s2389_s25, 32  ;;  %p2391_p10 = scmp.lt.s32.totalorder %s515_s23, %s2389_s25 }
  0x96   : > { %p2386_p1 = pnand %p2384_p8, %p3015_p9  ;;  %p2392_p7 = scmp.lt.s32.totalorder %s2390_s12, %s2383_s20 }
  0x98   : > { %p2387_p12 = pneg %p2386_p1  ;;  %p2393_p13 = por %p2392_p7, %p2391_p10 }
  0x9a   : > { %p2394_p6 = pnand %p2393_p13, %p2387_p12 }
  0x9c   : > { %2397 = shalt.err (!%p2394_p6)
}
  0x9d   : > { %2044 = dma.hbm_to_vmem [thread:$0]  (!%p2707_p5), %s512_s30, 16, %s515_s23, %s2719_s19  }
  0x9e   : > { %p3016_p2 = scmp.ne.s32.totalorder %s2997_s15, 0 }
  0x9f   : > { %s2777_s17 = sand.u32 (!%p3016_p2), 1, %s2478_s26   ;;  %p3017_p11 = scmp.ne.s32.totalorder (!%p3016_p2), %s3006_s22, 0 }
  0xa0   : > { %523 = sbr.rel (%p3016_p2) target bundleno = 1999 (0x7cf), region = 72  ;;  %s2780_s16 = sshll.u32 (!%p3016_p2), %s2777_s17, 3 }
  0xa1   : > { %s526_s7 = scalar_lea.sflag (!%p3016_p2), [#allocation3], %s2777_s17  ;;  %s529_s13 = scalar_lea.vmem (!%p3016_p2), [#allocation2], %s2780_s16 }
  0xa5   : > { %2449 = dma.done.wait (%p3017_p11), %s526_s7, 128  }
  0xa6   : > { %2451 = vsyncadd (%p3017_p11), %s526_s7, 4294967168  ;;  %s534_s15 = sand.u32 1, %s2620_s14   ;;  %s538_s11 = scalar_lea.vmem [#allocation5], %s2780_s16 }
  0xa7   : > { %s535_s19 = scalar_lea.sflag [#allocation6], %s534_s15 }
  0xa8   : > { %2453 = dma.done.wait (%p3017_p11), %s535_s19, 144  }
  0xa9   : > { %2455 = vsyncadd (%p3017_p11), %s535_s19, 4294967152  ;;  %s546_s18 = scalar_lea.vmem [#allocation7], %s2777_s17  ;;  %p3018_p5 = scmp.eq.s32.totalorder %s2620_s14, 0 }
  0xab   : > { %2457 = dma.done.wait (%p3018_p5), [#allocation9], 272   ;;  %p3019_p3 = pmov %p3018_p5 }
  0xad   : > { %2459 = vsyncadd (%p3019_p3), [#allocation9], 4294967024  ;;  %p3020_p0 = pmov %p3019_p3 }
  0xaf   : > { %2461 = dma.done.wait (%p3020_p0), [#allocation12], 272   ;;  %p3021_p4 = pmov %p3020_p0 }
  0xb0   : > { %p3022_p8 = pmov %p3020_p0 }
  0xb1   : > { %2463 = vsyncadd (%p3021_p4), [#allocation12], 4294967024 }
  0xb2   : > { %2465 = dma.done.wait (%p3022_p8), [#allocation15], 272   ;;  %p3023_p9 = pmov %p3020_p0 }
  0xb3   : > { %v2507_v0 = vmov 0.0   ;;  %vm2508_vm0 = vmmov 0   ;;  %v2130_v1 = vld [vmem:[#allocation11 + $0x8] sm:$0xff]   ;;  %v2131_v2 = vld [vmem:[#allocation11] sm:$0xff]   ;;  %v2132_v4 = vld [vmem:[#allocation8 + $0x8] sm:$0xff]   ;;  %vm651_vm1 = vcmask 261120  }
  0xb4   : > { %2467 = vsyncadd (%p3023_p9), [#allocation15], 4294967024  ;;  %1912 = vmatprep.subr.bf16.mxu1 %v2507_v0  ;;  %1916 = vmatprep.mubr.msk.bf16.mxu1 %vm2508_vm0, %v2507_v0  ;;  %v624_v3 = vld [vmem:[%s538_s11] sm:$0xff]  ;;  %v2133_v5 = vld [vmem:[#allocation8] sm:$0xff]   ;;  %s2509_s14 = smov 104   ;;  %s2510_s22 = smov 120  }
  0xb5   : > { %1904 = vmatprep.subr.bf16.mxu0 %v2507_v0  ;;  %1908 = vmatprep.mubr.msk.bf16.mxu0 %vm2508_vm0, %v2507_v0  ;;  %v2814_v6 = vld [vmem:[%s529_s13] sm:$0xff]  ;;  %v627_v7 = vpack.c.bf16 %v624_v3, %v624_v3  ;;  %v1845_v12 = vld [vmem:[#allocation10] ss:$0 sm:$0xff]  ;;  %s2511_s28 = smov 112   ;;  %vm919_vm2 = vcmask 1043456   ;;  %vm915_vm3 = vcmask 64512  }
  0xb6   : > { %1913 = vmatpush3.bf16.msra.mxu1 %v2130_v1  ;;  %1905 = vmatpush3.bf16.msra.mxu0 %v2132_v4  ;;  %v626_v8 = vpack.c.bf16 %v2814_v6, %v2814_v6  ;;  %v1849_v9 = vld [vmem:[#allocation13] ss:$0 sm:$0xff]  ;;  %v2134_v23 = vld [vmem:[#allocation14 + $0x8] sm:$0xff]   ;;  %v2135_v24 = vld [vmem:[#allocation14] sm:$0xff]   ;;  %s2515_s27 = smov 8   ;;  %s2516_s23 = smov 16  }
  0xb7   : > { %1914 = vmatprep.subr.bf16.mxu1 %v2507_v0  ;;  %1906 = vmatprep.subr.bf16.mxu0 %v2507_v0  ;;  %v1853_v43 = vld [vmem:[#allocation16] ss:$0 sm:$0xff]  ;;  %v1861_v48 = vld [vmem:[%s546_s18] ss:$0 sm:$0xff]  ;;  %s2517_s20 = smov 24   ;;  %vm1518_vm4 = vcmask 130048  }
  0xb8   : > { %vm1521_vm5 = vcmask 195584   ;;  %s3024_s12 = sld [smem:[#allocation26_spill]]  ;;  %s2518_s25 = smov [#allocation17]  }
  0xb9   : > { %s3025_s7 = sld [smem:[#allocation29_spill]]  ;;  %s2402_s13 = sshll.u32 %s2518_s25, 4  ;;  %s2403_s13 = int_to_ptr.vmem [resolvable:$false] %s2402_s13 }
  0xba   : > { %1915 = vmatpush3.bf16.msra.mxu1 %v2131_v2  ;;  %1907 = vmatpush3.bf16.msra.mxu0 %v2133_v5  ;;  %s3026_s19 = sld [smem:[#allocation35_spill]] }
  0xbb   : > { %1928 = vmatprep.subr.bf16.mxu1 %v2507_v0  ;;  %1920 = vmatprep.subr.bf16.mxu0 %v2507_v0  ;;  %s3028_s30 = sld [smem:[#allocation37_spill]] }
  0xbd   : > { %1917 = vmatmul.mubr.msk.bf16.vlgmr.msra.gmra.mxu1 %vm651_vm1, %v627_v7  ;;  %1909 = vmatmul.mubr.msk.bf16.vlgmr.msra.gmra.mxu0 %vm651_vm1, %v626_v8 }
  0xbe   : > { %1930 = vmatprep.mubr.msk.bf16.mxu1 %vm2508_vm0, %v2507_v0  ;;  %1924 = vmatprep.mubr.msk.bf16.mxu0 %vm2508_vm0, %v2507_v0 }
  0xbf   : > { %1921 = vmatpush3.bf16.msra.mxu0 %v2134_v23  ;;  %p3030_p12 = scmp.ne.s32.totalorder %s3025_s7, 0 }
  0xc0   : > { %1922 = vmatprep.subr.bf16.mxu0 %v2507_v0 }
  0xc3   : > { %1923 = vmatpush3.bf16.msra.mxu0 %v2135_v24 }
  0xc4   : > { %1934 = vmatprep.subr.bf16.mxu0 %v2507_v0 }
  0xc6   : > { %1925 = vmatmul.mubr.msk.bf16.vlgmr.msra.gmra.mxu0 %vm651_vm1, %v627_v7 }
  0xc7   : > { %1936 = vmatprep.mubr.msk.bf16.mxu0 %vm2508_vm0, %v2507_v0 }
 0x17d   : > { %v755_v10 = vpop.f32.mrf.mxu1  ;;  %v689_v15 = vpop.f32.mrf.mxu0 }
 0x17e   : > { %v756_v11 = vadd.f32 %v1849_v9, %v755_v10  ;;  %v690_v17 = vadd.f32 %v1845_v12, %v689_v15 }
 0x17f   : > { %v1918_v13 = vpop.f32.mrf.mxu1  ;;  %v1910_v18 = vpop.f32.mrf.mxu0 }
 0x180   : > { %v832_v14 = vpack.c.bf16 %v756_v11, %v756_v11  ;;  %v824_v20 = vpack.c.bf16 %v690_v17, %v690_v17 }
 0x181   : > { %v758_v16 = vpop.f32.mrf.mxu1  ;;  %v692_v21 = vpop.f32.mrf.mxu0 }
 0x182   : > { %840 = vrot.lane.b32.xlu1 %v832_v14, %s2509_s14  ;;  %834 = vrot.lane.b32.xlu0 %v832_v14, %s2510_s22 }
 0x183   : > { %v1919_v19 = vpop.f32.mrf.mxu1  ;;  %v1911_v22 = vpop.f32.mrf.mxu0 }
 0x186   : > { %837 = vrot.lane.b32.xlu0 %v832_v14, %s2511_s28  ;;  %826 = vrot.lane.b32.xlu1 %v824_v20, %s2510_s22  ;;  %v818_v35 = vpop.f32.mrf.mxu0 }
 0x187   : > { %v819_v44 = vadd.f32 %v1853_v43, %v818_v35 }
 0x188   : > { %v1926_v36 = vpop.f32.mrf.mxu0 }
 0x189   : > { %v2858_v45 = vpack.c.bf16 %v819_v44, %v819_v44 }
 0x18a   : > { %828 = vrot.lane.b32.xlu0 %v824_v20, %s2511_s28  ;;  %830 = vrot.lane.b32.xlu1 %v824_v20, %s2509_s14  ;;  %v821_v39 = vpop.f32.mrf.mxu0 }
 0x18b   : > { %v1167_v46 = vsel %vm919_vm2, %v2858_v45, 0 }
 0x18c   : > { %v1927_v40 = vpop.f32.mrf.mxu0 }
 0x1a8   : > { %851 = vxpose.xlu0.c.b16.start.end [1/1] (short) (narrow) %v832_v14, 16 }
 0x1f4   : > { %v835_v25 = vpop.permute.xlu0 %834  ;;  %v841_v27 = vpop.permute.xlu1 %840 }
 0x1f5   : > { %867 = vxpose.xlu1.c.b16.start.end [1/1] (short) (narrow) %v835_v25, 16 }
 0x1f8   : > { %v838_v26 = vpop.permute.xlu0 %837  ;;  %v827_v31 = vpop.permute.xlu1 %826 }
 0x1f9   : > { %883 = vxpose.xlu0.c.b16.start.end [1/1] (short) (narrow) %v838_v26, 16 }
 0x1fc   : > { %v829_v28 = vpop.permute.xlu0 %828  ;;  %v831_v32 = vpop.permute.xlu1 %830 }
 0x1fd   : > { %899 = vxpose.xlu0.c.b16.start.end [1/1] (short) (narrow) %v841_v27, 16 }
 0x20a   : > { %v859_v29 = vpop.trf.xlu0 }
 0x20b   : > { %v921_v30 = vsel %vm919_vm2, %v859_v29, 0 }
 0x20c   : > { %1929 = vmatpush3.bf16.msra.mxu1 %v921_v30 }
 0x20d   : > { %1940 = vmatprep.subr.bf16.mxu1 %v2507_v0 }
 0x20f   : > { %1931 = vmatmul.mubr.msk.bf16.vlgmr.msra.gmra.mxu1 %vm915_vm3, %v824_v20 }
 0x210   : > { %1942 = vmatprep.mubr.msk.bf16.mxu1 %vm2508_vm0, %v2507_v0 }
 0x257   : > { %v875_v33 = vpop.trf.xlu1 }
 0x258   : > { %v967_v34 = vsel %vm919_vm2, %v875_v33, 0 }
 0x259   : > { %1935 = vmatpush3.bf16.msra.mxu0 %v967_v34 }
 0x25a   : > { %1946 = vmatprep.subr.bf16.mxu0 %v2507_v0 }
 0x25b   : > { %v891_v37 = vpop.trf.xlu0 }
 0x25c   : > { %v1013_v38 = vsel %vm919_vm2, %v891_v37, 0  ;;  %1937 = vmatmul.mubr.msk.bf16.vlgmr.msra.gmra.mxu0 %vm915_vm3, %v827_v31 }
 0x25d   : > { %1941 = vmatpush3.bf16.msra.mxu1 %v1013_v38  ;;  %1948 = vmatprep.mubr.msk.bf16.mxu0 %vm2508_vm0, %v2507_v0 }
 0x25e   : > { %1952 = vmatprep.subr.bf16.mxu1 %v2507_v0 }
 0x25f   : > { %v907_v41 = vpop.trf.xlu0 }
 0x260   : > { %v1059_v42 = vsel %vm919_vm2, %v907_v41, 0  ;;  %1943 = vmatmul.mubr.msk.bf16.vlgmr.msra.gmra.mxu1 %vm915_vm3, %v829_v28 }
 0x261   : > { %1947 = vmatpush3.bf16.msra.mxu0 %v1059_v42  ;;  %1954 = vmatprep.mubr.msk.bf16.mxu1 %vm2508_vm0, %v2507_v0 }
 0x262   : > { %1958 = vmatprep.subr.bf16.mxu0 %v2507_v0  ;;  %1953 = vmatpush3.bf16.msra.mxu1 %v1167_v46 }
 0x263   : > { %1964 = vmatprep.subr.bf16.mxu1 %v2507_v0 }
 0x264   : > { %1949 = vmatmul.mubr.msk.bf16.vlgmr.msra.gmra.mxu0 %vm915_vm3, %v831_v32 }
 0x265   : > { %1960 = vmatprep.mubr.msk.bf16.mxu0 %vm2508_vm0, %v2507_v0 }
 0x2cf   : > { %v957_v47 = vpop.f32.mrf.mxu1 }
 0x2d0   : > { %v1101_v49 = vmul.f32 0.35355338, %v957_v47 }
 0x2d1   : > { %v1932_v50 = vpop.f32.mrf.mxu1 }
 0x2d2   : > { %v1111_v51 = vadd.f32 %v1861_v48, %v1101_v49 }
 0x2d3   : > { %v960_v52 = vpop.f32.mrf.mxu1 }
 0x2d4   : > { %v1115_v53 = vsel %vm915_vm3, %v1111_v51, -inf }
 0x2d5   : > { %v1933_v54 = vpop.f32.mrf.mxu1  ;;  %1116 = vmax.xlane.f32.xlu1 %v1115_v53 }
 0x31c   : > { %v1003_v55 = vpop.f32.mrf.mxu0 }
 0x31d   : > { %v1102_v56 = vmul.f32 0.35355338, %v1003_v55 }
 0x31e   : > { %v1938_v57 = vpop.f32.mrf.mxu0 }
 0x31f   : > { %v1112_v58 = vadd.f32 %v1861_v48, %v1102_v56  ;;  %v2136_v56 = vld [vmem:[%s2966_s9 + $0x8] sm:$0xff]  }
 0x320   : > { %v1006_v59 = vpop.f32.mrf.mxu0  ;;  %v1049_v60 = vpop.f32.mrf.mxu1 }
 0x321   : > { %v1103_v61 = vmul.f32 0.35355338, %v1049_v60  ;;  %v1118_v62 = vsel %vm915_vm3, %v1112_v58, -inf }
 0x322   : > { %v1944_v63 = vpop.f32.mrf.mxu1  ;;  %1119 = vmax.xlane.f32.xlu0 %v1118_v62  ;;  %v1939_v1 = vpop.f32.mrf.mxu0 }
 0x323   : > { %v1113_v2 = vadd.f32 %v1861_v48, %v1103_v61  ;;  %v2512_v61 = vmov 1983009808   ;;  %v1351_v63 = vlaneseq }
 0x324   : > { %v1052_v3 = vpop.f32.mrf.mxu1  ;;  %v1095_v4 = vpop.f32.mrf.mxu0  ;;  %v1349_v62 = vunpack.c.l.s4 %v2512_v61 }
 0x325   : > { %v1104_v5 = vmul.f32 0.35355338, %v1095_v4  ;;  %v1121_v7 = vsel %vm915_vm3, %v1113_v2, -inf  ;;  %v2513_v3 = vmov 1934713408  }
 0x326   : > { %v1945_v8 = vpop.f32.mrf.mxu1  ;;  %1122 = vmax.xlane.f32.xlu1 %v1121_v7  ;;  %v1950_v9 = vpop.f32.mrf.mxu0  ;;  %v1350_v1 = vunpack.c.0.s8 %v1349_v62  ;;  %v1366_v4 = vunpack.c.l.s4 %v2513_v3  ;;  %v2137_v62 = vld [vmem:[%s2966_s9] sm:$0xff]  }
 0x327   : > { %v1114_v10 = vadd.f32 %v1861_v48, %v1104_v5 }
 0x328   : > { %v1098_v11 = vpop.f32.mrf.mxu0 }
 0x329   : > { %v1124_v12 = vsel %vm915_vm3, %v1114_v10, -inf }
 0x32a   : > { %1125 = vmax.xlane.f32.xlu0 %v1124_v12  ;;  %v1951_v13 = vpop.f32.mrf.mxu0 }
 0x337   : > { %845 = vrot.lane.b32.xlu1 %v2858_v45, %s2510_s22  ;;  %s1873_s22 = sshll.u32 %s3024_s12, 7 }
 0x35e   : > { %v1117_v14 = vpop.xlane.xlu1 %1116 }
 0x35f   : > { %v1127_v15 = vsub.f32 %v1111_v51, %v1117_v14 }
 0x361   : > { %v1131_v16 = vmul.f32 1.442695, %v1127_v15 }
 0x363   : > { %2138 = vpow2.f32 %v1131_v16 }
 0x370   : > { %v2139_v17 = vpop.eup %2138 }
 0x371   : > { %v1139_v18 = vsel %vm915_vm3, %v2139_v17, 0.0 }
 0x372   : > { %1140 = vadd.xlane.f32.xlu1 %v1139_v18 }
 0x3ab   : > { %v1120_v19 = vpop.xlane.xlu0 %1119 }
 0x3ac   : > { %v1128_v20 = vsub.f32 %v1112_v58, %v1120_v19 }
 0x3ae   : > { %v1133_v21 = vmul.f32 1.442695, %v1128_v20 }
 0x3af   : > { %v1123_v22 = vpop.xlane.xlu1 %1122 }
 0x3b0   : > { %2140 = vpow2.f32 %v1133_v21  ;;  %v1129_v23 = vsub.f32 %v1113_v2, %v1123_v22  ;;  %v1352_v2 = vshrl.u32 %v1351_v63, 7 }
 0x3b2   : > { %v1135_v24 = vmul.f32 1.442695, %v1129_v23  ;;  %v1353_v9 = vsub.s32 %v1350_v1, %v1352_v2 }
 0x3b3   : > { %v846_v25 = vpop.permute.xlu1 %845  ;;  %v1126_v26 = vpop.xlane.xlu0 %1125 }
 0x3b4   : > { %2142 = vpow2.f32 %v1135_v24  ;;  %v1213_v27 = vsel %vm919_vm2, %v846_v25, 0  ;;  %v1130_v28 = vsub.f32 %v1114_v10, %v1126_v26  ;;  %v1367_v10 = vunpack.c.0.s8 %v1366_v4 }
 0x3b5   : > { %1959 = vmatpush3.bf16.msra.mxu0 %v1213_v27 }
 0x3b6   : > { %v1137_v29 = vmul.f32 1.442695, %v1130_v28  ;;  %1970 = vmatprep.subr.bf16.mxu0 %v2507_v0 }
 0x3b8   : > { %2144 = vpow2.f32 %v1137_v29 }
 0x3bd   : > { %v2141_v30 = vpop.eup %2140 }
 0x3be   : > { %v1142_v31 = vsel %vm915_vm3, %v2141_v30, 0.0 }
 0x3bf   : > { %1143 = vadd.xlane.f32.xlu0 %v1142_v31 }
 0x3c1   : > { %v2143_v32 = vpop.eup %2142 }
 0x3c2   : > { %v1145_v33 = vsel %vm915_vm3, %v2143_v32, 0.0 }
 0x3c3   : > { %1146 = vadd.xlane.f32.xlu1 %v1145_v33 }
 0x3c5   : > { %v2145_v34 = vpop.eup %2144 }
 0x3c6   : > { %v1148_v35 = vsel %vm915_vm3, %v2145_v34, 0.0 }
 0x3c7   : > { %1149 = vadd.xlane.f32.xlu0 %v1148_v35 }
 0x3d4   : > { %849 = vrot.lane.b32.xlu1 %v2858_v45, %s2509_s14  ;;  %s3027_s14 = sld [smem:[#allocation36_spill]] }
 0x3dd   : > { %847 = vrot.lane.b32.xlu0 %v2858_v45, %s2511_s28  ;;  %s621_s28 = scalar_lea.vmem [#allocation17], %s2780_s16  ;;  %s2404_s16 = scalar_lea.vmem %s2403_s13, 256 }
 0x3de   : > { %s1643_s21 = sshll.u32 %s621_s28, 4  ;;  %s1644_s21 = int_to_ptr.vmem [resolvable:$true] %s1643_s21 }
 0x3df   : > { %s2398_s24 = scalar_lea.vmem %s1644_s21, 128  ;;  %p2405_p13 = scmp.lt.s32.totalorder %s1644_s21, %s2403_s13 }
 0x3e0   : > { %p2399_p1 = scmp.ne.s32.totalorder %s1644_s21, %s2398_s24  ;;  %p2406_p6 = scmp.lt.s32.totalorder %s2404_s16, %s2398_s24 }
 0x3e2   : > { %p2400_p10 = pnand %p2399_p1, %p3030_p12  ;;  %p2407_p2 = por %p2406_p6, %p2405_p13 }
 0x3e4   : > { %p2401_p7 = pneg %p2400_p10 }
 0x3e6   : > { %p2408_p11 = pnand %p2407_p2, %p2401_p7 }
 0x3fb   : > { %v1141_v36 = vpop.xlane.xlu1 %1140 }
 0x3fc   : > { %2146 = vrcp.f32 %v1141_v36 }
 0x409   : > { %v2147_v37 = vpop.eup %2146 }
 0x40a   : > { %v1155_v38 = vmul.f32 %v2147_v37, %v2139_v17  ;;  %v1370_v17 = vsub.s32 %v1367_v10, %v1352_v2 }
 0x40c   : > { %v1159_v39 = vpack.c.bf16 %v1155_v38, %v1155_v38 }
 0x40e   : > { %1955 = vmatmul.mubr.msk.bf16.vlgmr.msra.gmra.mxu1 %vm915_vm3, %v1159_v39 }
 0x40f   : > { %1966 = vmatprep.mubr.msk.bf16.mxu1 %vm2508_vm0, %v2507_v0 }
 0x448   : > { %v1144_v40 = vpop.xlane.xlu0 %1143 }
 0x449   : > { %2148 = vrcp.f32 %v1144_v40 }
 0x44c   : > { %v1147_v41 = vpop.xlane.xlu1 %1146 }
 0x44d   : > { %2150 = vrcp.f32 %v1147_v41 }
 0x450   : > { %v1150_v42 = vpop.xlane.xlu0 %1149  ;;  %v850_v47 = vpop.permute.xlu1 %849 }
 0x451   : > { %2152 = vrcp.f32 %v1150_v42  ;;  %v1305_v50 = vsel %vm919_vm2, %v850_v47, 0 }
 0x454   : > { %v848_v43 = vpop.permute.xlu0 %847 }
 0x455   : > { %v1259_v44 = vsel %vm919_vm2, %v848_v43, 0 }
 0x456   : > { %v2149_v45 = vpop.eup %2148  ;;  %1965 = vmatpush3.bf16.msra.mxu1 %v1259_v44 }
 0x457   : > { %v1156_v46 = vmul.f32 %v2149_v45, %v2141_v30  ;;  %1976 = vmatprep.subr.bf16.mxu1 %v2507_v0 }
 0x459   : > { %v1160_v48 = vpack.c.bf16 %v1156_v46, %v1156_v46 }
 0x45a   : > { %v2151_v49 = vpop.eup %2150 }
 0x45b   : > { %1961 = vmatmul.mubr.msk.bf16.vlgmr.msra.gmra.mxu0 %vm915_vm3, %v1160_v48  ;;  %v1157_v51 = vmul.f32 %v2151_v49, %v2143_v32 }
 0x45c   : > { %1971 = vmatpush3.bf16.msra.mxu0 %v1305_v50  ;;  %1972 = vmatprep.mubr.msk.bf16.mxu0 %vm2508_vm0, %v2507_v0 }
 0x45d   : > { %v1161_v52 = vpack.c.bf16 %v1157_v51, %v1157_v51 }
 0x45e   : > { %v2153_v53 = vpop.eup %2152 }
 0x45f   : > { %1967 = vmatmul.mubr.msk.bf16.vlgmr.msra.gmra.mxu1 %vm915_vm3, %v1161_v52  ;;  %v1158_v54 = vmul.f32 %v2153_v53, %v2145_v34  ;;  %v2514_v34 = vmov 0  }
 0x460   : > { %1980 = vmatprep.mubr.msk.bf16.mxu1 %vm2508_vm0, %v2507_v0  ;;  %1977 = vmatpush3.bf16.msra.mxu1 %v2136_v56 }
 0x461   : > { %v1162_v55 = vpack.c.bf16 %v1158_v54, %v1158_v54  ;;  %1978 = vmatprep.subr.bf16.mxu1 %v2507_v0 }
 0x463   : > { %1973 = vmatmul.mubr.msk.bf16.vlgmr.msra.gmra.mxu0 %vm915_vm3, %v1162_v55 }
 0x464   : > { %1979 = vmatpush3.bf16.msra.mxu1 %v2137_v62 }
 0x4ce   : > { %v1203_v57 = vpop.f32.mrf.mxu1 }
 0x4cf   : > { %v1347_v8 = vpack.c.bf16 %v1203_v57, %v1203_v57 }
 0x4d0   : > { %v1956_v58 = vpop.f32.mrf.mxu1 }
 0x4d1   : > { %v1354_v15 = vrot.slane %v1347_v8, %v1353_v9 }
 0x4d2   : > { %v1206_v59 = vpop.f32.mrf.mxu1 }
 0x4d4   : > { %v1957_v60 = vpop.f32.mrf.mxu1 }
 0x51b   : > { %v1249_v5 = vpop.f32.mrf.mxu0 }
 0x51c   : > { %v1381_v18 = vpack.c.bf16 %v1249_v5, %v1249_v5 }
 0x51d   : > { %v1962_v7 = vpop.f32.mrf.mxu0 }
 0x51e   : > { %v1388_v28 = vrot.slane %v1381_v18, %v1353_v9 }
 0x51f   : > { %v1252_v11 = vpop.f32.mrf.mxu0  ;;  %v1295_v12 = vpop.f32.mrf.mxu1 }
 0x520   : > { %v1355_v13 = vpack.c.bf16 %v1295_v12, %v1295_v12 }
 0x521   : > { %v1963_v0 = vpop.f32.mrf.mxu0  ;;  %v1968_v14 = vpop.f32.mrf.mxu1 }
 0x522   : > { %v1362_v16 = vrot.slane %v1355_v13, %v1353_v9 }
 0x523   : > { %v1298_v19 = vpop.f32.mrf.mxu1  ;;  %v1341_v20 = vpop.f32.mrf.mxu0 }
 0x524   : > { %v1363_v21 = vcombine.low %v1354_v15, %v1362_v16  ;;  %v1364_v22 = vcombine.high %v1354_v15, %v1362_v16  ;;  %v1389_v23 = vpack.c.bf16 %v1341_v20, %v1341_v20 }
 0x525   : > { %v1969_v24 = vpop.f32.mrf.mxu1  ;;  %v1974_v25 = vpop.f32.mrf.mxu0 }
 0x526   : > { %v1371_v26 = vrot.slane %v1363_v21, %v1370_v17  ;;  %v1396_v27 = vrot.slane %v1389_v23, %v1353_v9  ;;  %v1378_v30 = vrot.slane %v1364_v22, %v1370_v17  ;;  %v1866_v23 = vld [vmem:[%s2967_s10] ss:$0 sm:$0xff] }
 0x527   : > { %v1344_v29 = vpop.f32.mrf.mxu0 }
 0x528   : > { %v1397_v31 = vcombine.low %v1388_v28, %v1396_v27  ;;  %v1398_v32 = vcombine.high %v1388_v28, %v1396_v27  ;;  %v1379_v35 = vcombine.high %v1371_v26, %v2514_v34  ;;  %v1380_v38 = vcombine.high %v1378_v30, %v2514_v34 }
 0x529   : > { %v1975_v33 = vpop.f32.mrf.mxu0  ;;  %v1419_v39 = vshrl.u32 %v1371_v26, 16  ;;  %v1435_v45 = vshrl.u32 %v1378_v30, 16 }
 0x52a   : > { %v1405_v36 = vrot.slane %v1397_v31, %v1370_v17  ;;  %v1412_v37 = vrot.slane %v1398_v32, %v1370_v17  ;;  %v1427_v44 = vshrl.u32 %v1379_v35, 16  ;;  %v1443_v52 = vshrl.u32 %v1380_v38, 16 }
 0x52c   : > { %v1413_v40 = vcombine.high %v1405_v36, %v2514_v34  ;;  %v1414_v41 = vcombine.high %v1412_v37, %v2514_v34  ;;  %v1417_v42 = vpack.i.b16 %v1405_v36, %v1371_v26  ;;  %v1420_v43 = vshrl.u32 %v1405_v36, 16 }
 0x52d   : > { %v1433_v46 = vpack.i.b16 %v1412_v37, %v1378_v30  ;;  %v1436_v47 = vshrl.u32 %v1412_v37, 16 }
 0x52e   : > { %v1421_v48 = vpack.i.b16 %v1420_v43, %v1419_v39  ;;  %v1425_v49 = vpack.i.b16 %v1413_v40, %v1379_v35  ;;  %v1428_v50 = vshrl.u32 %v1413_v40, 16  ;;  %v1441_v51 = vpack.i.b16 %v1414_v41, %v1380_v38 }
 0x52f   : > { %v1437_v53 = vpack.i.b16 %v1436_v47, %v1435_v45  ;;  %v1444_v54 = vshrl.u32 %v1414_v41, 16  ;;  %v1447_v55 = vcombine.low %v1417_v42, %v1433_v46  ;;  %v1871_v46 = vld [vmem:[%s3027_s14] ss:$0 sm:$0xff] }
 0x530   : > { %v1429_v56 = vpack.i.b16 %v1428_v50, %v1427_v44  ;;  %v1455_v57 = vcombine.low %v1425_v49, %v1441_v51  ;;  %v1870_v44 = vld [vmem:[%s3026_s19] ss:$0 sm:$0xff] }
 0x531   : > { %v1445_v58 = vpack.i.b16 %v1444_v54, %v1443_v52  ;;  %v1472_v59 = vcombine.low %v1421_v48, %v1437_v53  ;;  %v1454_v60 = vrot.slane %v1447_v55, %v1353_v9 }
 0x532   : > { %v1462_v61 = vrot.slane %v1455_v57, %v1353_v9 }
 0x533   : > { %v1480_v63 = vcombine.low %v1429_v56, %v1445_v58  ;;  %v1479_v2 = vrot.slane %v1472_v59, %v1353_v9 }
 0x534   : > { %v1463_v1 = vcombine.low %v1454_v60, %v1462_v61 }
 0x535   : > { %v1487_v3 = vrot.slane %v1480_v63, %v1353_v9 }
 0x536   : > { %v1470_v4 = vrot.slane %v1463_v1, %v1370_v17 }
 0x537   : > { %v1488_v5 = vcombine.low %v1479_v2, %v1487_v3 }
 0x538   : > { %v1500_v8 = vshrl.u32 %v1470_v4, 16  ;;  %v1471_v11 = vcombine.high %v1470_v4, %v2514_v34 }
 0x539   : > { %v1495_v7 = vrot.slane %v1488_v5, %v1370_v17 }
 0x53a   : > { %v1506_v16 = vshrl.u32 %v1471_v11, 16 }
 0x53b   : > { %v1501_v10 = vshrl.u32 %v1495_v7, 16  ;;  %v1496_v12 = vcombine.high %v1495_v7, %v2514_v34  ;;  %v1499_v13 = vpack.i.b16 %v1495_v7, %v1470_v4 }
 0x53d   : > { %v1502_v0 = vpack.i.b16 %v1501_v10, %v1500_v8  ;;  %v1505_v14 = vpack.i.b16 %v1496_v12, %v1471_v11  ;;  %v1507_v15 = vshrl.u32 %v1496_v12, 16 }
 0x53f   : > { %1509 = vrot.lane.b32.xlu1 %v1502_v0, %s2515_s27  ;;  %1511 = vrot.lane.b32.xlu0 %v1505_v14, %s2516_s23  ;;  %v1508_v18 = vpack.i.b16 %v1507_v15, %v1506_v16  ;;  %s3029_s23 = smov %s3028_s30  ;;  %s1641_s27 = scalar_lea.hbm %s3028_s30, %s1873_s22 }
 0x543   : > { %1513 = vrot.lane.b32.xlu1 %v1508_v18, %s2517_s20  ;;  %s1629_s20 = scalar_lea.sflag [#allocation4], %s2777_s17 }
 0x5b1   : > { %v1510_v9 = vpop.permute.xlu1 %1509  ;;  %v1512_v17 = vpop.permute.xlu0 %1511 }
 0x5b2   : > { %v1517_v19 = vsel %vm915_vm3, %v1499_v13, %v1510_v9 }
 0x5b3   : > { %v1520_v20 = vsel %vm1518_vm4, %v1517_v19, %v1512_v17 }
 0x5b5   : > { %v1514_v21 = vpop.permute.xlu1 %1513 }
 0x5b6   : > { %v1523_v22 = vsel %vm1521_vm5, %v1520_v20, %v1514_v21 }
 0x5b7   : > { %1981 = vmatmul.mubr.msk.bf16.vlgmr.msra.gmra.mxu1 %vm651_vm1, %v1523_v22 }
 0x677   : > { %v1583_v24 = vpop.f32.mrf.mxu1 }
 0x678   : > { %v1584_v25 = vadd.f32 %v1866_v23, %v1583_v24 }
 0x679   : > { %v1982_v26 = vpop.f32.mrf.mxu1 }
 0x67a   : > { %v1589_v27 = vadd.f32 %v1584_v25, %v2814_v6 }
 0x67b   : > { %v1586_v28 = vpop.f32.mrf.mxu1 }
 0x67c   : > { %v1592_v29 = vsel %vm651_vm1, %v1589_v27, 0.0 }
 0x67d   : > { %1593 = vadd.xlane.f32.xlu0 %v1592_v29  ;;  %v1983_v30 = vpop.f32.mrf.mxu1 }
 0x706   : > { %v1594_v31 = vpop.xlane.xlu0 %1593 }
 0x707   : > { %v1596_v32 = vmul.f32 0.03125, %v1594_v31 }
 0x709   : > { %v1597_v33 = vsub.f32 %v1589_v27, %v1596_v32 }
 0x70b   : > { %v1598_v34 = vmul.f32 %v1597_v33, %v1597_v33 }
 0x70d   : > { %v1599_v35 = vsel %vm651_vm1, %v1598_v34, 0.0 }
 0x70e   : > { %1600 = vadd.xlane.f32.xlu1 %v1599_v35 }
 0x797   : > { %v1601_v36 = vpop.xlane.xlu1 %1600 }
 0x798   : > { %v1602_v37 = vmul.f32 0.03125, %v1601_v36 }
 0x79a   : > { %v1603_v38 = vadd.f32 1e-12, %v1602_v37 }
 0x79c   : > { %2154 = vrsqrt.f32 %v1603_v38  ;;  %vm1606_vm6 = vcmp.eq.f32.partialorder %v1603_v38, inf  ;;  %v1609_v40 = vand.u32 2147483648, %v1603_v38  ;;  %vm1608_vm7 = vcmp.eq.f32.partialorder %v1603_v38, 0.0 }
 0x7a9   : > { %v2155_v39 = vpop.eup %2154 }
 0x7aa   : > { %v1605_v6 = vmul.f32 %v2155_v39, %v1603_v38 }
 0x7ac   : > { %v1607_v41 = vsel %vm1606_vm6, %v1603_v38, %v1605_v6 }
 0x7ad   : > { %v1610_v42 = vsel %vm1608_vm7, %v1609_v40, %v1607_v41 }
 0x7ae   : > { %2156 = vrcp.f32 %v1610_v42 }
 0x7bb   : > { %v2157_v43 = vpop.eup %2156 }
 0x7bc   : > { %v1612_v45 = vmul.f32 %v2157_v43, %v1597_v33 }
 0x7be   : > { %v1619_v47 = vmul.f32 %v1870_v44, %v1612_v45 }
 0x7c0   : > { %v1626_v48 = vadd.f32 %v1871_v46, %v1619_v47 }
 0x7c2   : > { %1627 = vst.msk [vmem:[%s621_s28] sm:$0xff] %vm651_vm1, %v1626_v48 }
 0x7c3   : > { %2411 = shalt.err (!%p2408_p11)
}
 0x7c4   : > { %s2412_s12 = scalar_lea.hbm %s1641_s27, 128  ;;  %s2416_s19 = scalar_lea.hbm %s3029_s23, 256 }
 0x7c5   : > { %p2413_p5 = scmp.ne.s32.totalorder %s1641_s27, %s2412_s12  ;;  %p2417_p4 = scmp.lt.s32.totalorder %s1641_s27, %s3029_s23 }
 0x7c6   : > { %p2418_p8 = scmp.lt.s32.totalorder %s2416_s19, %s2412_s12 }
 0x7c7   : > { %p2414_p3 = pnand %p2413_p5, %p3030_p12 }
 0x7c8   : > { %p2419_p9 = por %p2418_p8, %p2417_p4 }
 0x7c9   : > { %p2415_p0 = pneg %p2414_p3 }
 0x7cb   : > { %p2420_p1 = pnand %p2419_p9, %p2415_p0 }
 0x7cd   : > { %2423 = shalt.err (!%p2420_p1)
}
 0x7ce   : > { %2014 = dma.vmem_to_hbm [thread:$0]  (%p3030_p12), %s1644_s21, 128, %s1641_s27, %s1629_s20  }
 0x7cf PF: > { %s3031_s14 = sld [smem:[#allocation24_spill]] }
 0x7d0   : > { %s3032_s22 = sld [smem:[#allocation31_spill]] }
 0x7d1   : > { %s3033_s28 = sld [smem:[#allocation27_spill]] }
 0x7d5   : > { %s1655_s3 = sand.u32 1, %s3031_s14  }
 0x7d6   : > { %p3034_p10 = scmp.ne.s32.totalorder %s3032_s22, 0  ;;  %s1656_s5 = scalar_lea.sflag [#allocation4], %s1655_s3 }
 0x7d7   : > { %p3035_p7 = scmp.ge.s32.totalorder %s3033_s28, 2 }
 0x7d9   : > { %p2046_p13 = pnand %p3035_p7, %p3034_p10 }
 0x7db   : > { %p2047_p6 = pneg %p2046_p13 }
 0x7dd   : > { %2469 = dma.done.wait (%p2047_p6), %s1656_s5, 128  }
 0x7de   : > { %2471 = vsyncadd (%p2047_p6), %s1656_s5, 4294967168  ;;  %s35_s30 = sadd.s32 1, %s3033_s28   ;;  %s3036_s24 = sld [smem:[#allocation25_spill]] }
 0x7df   : > { %p32_p2 = scmp.ge.s32.totalorder %s35_s30, 4   ;;  %s3037_s27 = sld [smem:[#allocation30_spill]] }
 0x7e0   : > { %s3038_s7 = sld [smem:[#allocation28_spill]]  ;;  %s3039_s25 = smov %s2478_s26 }
 0x7e1   : > { %s3041_s28 = smov %s2490_s29 }
 0x7e2   :  { %34 = sbr.rel (!%p32_p2) target bundleno = 18 (0x12), region = 165 }
 0x7e4   : > { %s3040_s26 = smov %s3036_s24 }
 0x7e6   : > { %s3042_s29 = smov %s3038_s7 }
 0x7e7   :  { %1661 = vsyncpa [#allocation3], 1 }
 0x7e8   :  { %1663 = vsyncpa [#allocation3 + $0x1], 1 }
 0x7e9   :  { %1664 = vsyncpa [#allocation6], 1 }
 0x7ea   :  { %1666 = vsyncpa [#allocation6 + $0x1], 1 }
 0x7eb   :  { %1667 = vsyncpa [#allocation9], 1 }
 0x7ec   :  { %1668 = vsyncpa [#allocation12], 1 }
 0x7ed   :  { %1669 = vsyncpa [#allocation15], 1 }
 0x7ee   :  { %1670 = vsyncpa [#allocation4], 1 }
 0x7ef   :  { %1672 = vsyncpa [#allocation4 + $0x1], 1 }

</bundles_post_ra>
